<compile_context>
chip_gen: v5e
topology: v5e:2x2
jax: 0.10.0
libtpu: 0.0.40
codegen_flags: <defaults>
</compile_context>

<pallas_src>
import functools

import jax
import jax.numpy as jnp
from jax.experimental import pallas as pl
from jax.experimental.pallas import tpu as pltpu

BN_EPS = 1e-5
LANE = 128
TILE_B = 128  # batch tile: multiple of 128 (MXU-aligned on v5e/v6e/v7x).
              # For large batches raise to 512 on v5e/v6e; keep ~128-256 on v7x.


def _round_up(n, m):
    return (n + m - 1) // m * m


def subnet_kernel(x_ref, w1_ref, b1_ref, w2_ref, b2_ref, w3_ref, b3_ref,
                  o_ref, act_ref):
    """One batch tile: relu(relu(relu(x@W1+b1)@W2+b2)@W3+b3)."""
    x = x_ref[...]                                                 # (TILE_B, IN_P) bf16

    # Layer 1 (BatchNorm already folded into W1/b1 by the wrapper).
    y = jnp.dot(x, w1_ref[...], preferred_element_type=jnp.float32)
    act_ref[...] = jnp.maximum(y + b1_ref[...], 0.0)

    # Layer 2.
    y = jnp.dot(act_ref[...].astype(jnp.bfloat16), w2_ref[...],
                preferred_element_type=jnp.float32)
    act_ref[...] = jnp.maximum(y + b2_ref[...], 0.0)

    # Layer 3.
    y = jnp.dot(act_ref[...].astype(jnp.bfloat16), w3_ref[...],
                preferred_element_type=jnp.float32)
    o_ref[...] = jnp.maximum(y + b3_ref[...], 0.0).astype(o_ref.dtype)


@functools.partial(jax.jit, static_argnames=("tile_b",))
def subnet_forward(x, params, *, tile_b=TILE_B):
    """x: (batch, in_size) float32. params: dict of gamma/beta/W1..b3."""
    batch, in_size = x.shape
    hidden = params["w1"].shape[1]

    x32 = x.astype(jnp.float32)

    # ---- BatchNorm1d (training-mode batch stats, biased var) folded into L1 ----
    mean = jnp.mean(x32, axis=0)
    var = jnp.mean(jnp.square(x32 - mean), axis=0)
    scale = params["gamma"].reshape(-1) * jax.lax.rsqrt(var + BN_EPS)
    shift = params["beta"].reshape(-1) - mean * scale
    w1f = scale[:, None] * params["w1"]                      # (in, hidden)
    b1f = params["b1"].reshape(-1) + shift @ params["w1"]    # (hidden,)

    # Dropout: identity (eval mode).  TODO(synk): stochastic dropout masking.

    # ---- Pad to lane-dense / MXU-friendly shapes ----
    in_p = _round_up(in_size, LANE)
    hid_p = _round_up(hidden, LANE)
    b_p = _round_up(batch, tile_b)

    def pad2(a, rows, cols):
        return jnp.pad(a, ((0, rows - a.shape[0]), (0, cols - a.shape[1])))

    xp = pad2(x32, b_p, in_p).astype(jnp.bfloat16)
    w1p = pad2(w1f, in_p, hid_p).astype(jnp.bfloat16)
    w2p = pad2(params["w2"], hid_p, hid_p).astype(jnp.bfloat16)
    w3p = pad2(params["w3"], hid_p, hid_p).astype(jnp.bfloat16)
    b1p = pad2(b1f.reshape(1, -1), 1, hid_p).astype(jnp.float32)
    b2p = pad2(params["b2"].reshape(1, -1), 1, hid_p).astype(jnp.float32)
    b3p = pad2(params["b3"].reshape(1, -1), 1, hid_p).astype(jnp.float32)

    grid = (b_p // tile_b,)
    const = lambda i: (0, 0)

    flops = 2 * b_p * (in_p * hid_p + 2 * hid_p * hid_p)
    bytes_accessed = (xp.size * 2
                      + (w1p.size + w2p.size + w3p.size) * 2
                      + (b1p.size + b2p.size + b3p.size) * 4
                      + b_p * hid_p * 4)

    out = pl.pallas_call(
        subnet_kernel,
        out_shape=jax.ShapeDtypeStruct((b_p, hid_p), jnp.float32),
        grid_spec=pltpu.PrefetchScalarGridSpec(
            num_scalar_prefetch=0,
            grid=grid,
            in_specs=[
                pl.BlockSpec((tile_b, in_p), lambda i: (i, 0)),   # x tile
                pl.BlockSpec((in_p, hid_p), const),               # W1 (resident)
                pl.BlockSpec((1, hid_p), const),                  # b1
                pl.BlockSpec((hid_p, hid_p), const),              # W2
                pl.BlockSpec((1, hid_p), const),                  # b2
                pl.BlockSpec((hid_p, hid_p), const),              # W3
                pl.BlockSpec((1, hid_p), const),                  # b3
            ],
            out_specs=pl.BlockSpec((tile_b, hid_p), lambda i: (i, 0)),
            scratch_shapes=[pltpu.VMEM((tile_b, hid_p), jnp.float32)],
        ),
        compiler_params=pltpu.CompilerParams(
            dimension_semantics=("parallel",),
            vmem_limit_bytes=32 * 1024 * 1024,
        ),
        cost_estimate=pl.CostEstimate(
            flops=flops, transcendentals=0, bytes_accessed=bytes_accessed),
    )(xp, w1p, b1p, w2p, b2p, w3p, b3p)

    return out[:batch, :hidden]


def subnet_reference(x, params):
    """Pure-JAX reference (same bf16 weight/activation precision path)."""
    x = x.astype(jnp.float32)
    mean = jnp.mean(x, axis=0)
    var = jnp.mean(jnp.square(x - mean), axis=0)
    h = (x - mean) * jax.lax.rsqrt(var + BN_EPS) * params["gamma"] + params["beta"]
    for wk, bk in (("w1", "b1"), ("w2", "b2"), ("w3", "b3")):
        w = params[wk].astype(jnp.bfloat16)
        h = jnp.dot(h.astype(jnp.bfloat16), w, preferred_element_type=jnp.float32)
        h = jnp.maximum(h + params[bk].reshape(1, -1), 0.0)
    return h


def init_params(key, in_size, hidden_size):
    """Deterministic parameter init (PyTorch-Linear-style uniform bounds)."""
    ks = jax.random.split(key, 6)

    def linear(kw, kb, fan_in, fan_out):
        bound = 1.0 / jnp.sqrt(jnp.float32(fan_in))
        w = jax.random.uniform(kw, (fan_in, fan_out), jnp.float32, -bound, bound)
        b = jax.random.uniform(kb, (fan_out,), jnp.float32, -bound, bound)
        return w, b

    w1, b1 = linear(ks[0], ks[1], in_size, hidden_size)
    w2, b2 = linear(ks[2], ks[3], hidden_size, hidden_size)
    w3, b3 = linear(ks[4], ks[5], hidden_size, hidden_size)

    return {
        "gamma": jnp.ones((in_size,), jnp.float32),   # BN weight init
        "beta": jnp.zeros((in_size,), jnp.float32),   # BN bias init
        "w1": w1, "b1": b1,
        "w2": w2, "b2": b2,
        "w3": w3, "b3": b3,
    }


if __name__ == "__main__":
    batch, in_size, hidden_size = 200, 16, 32   # padded internally to 256 x 128

    key = jax.random.PRNGKey(0)
    kx, kp = jax.random.split(key)
    x = jax.random.normal(kx, (batch, in_size), jnp.float32)
    params = init_params(kp, in_size, hidden_size)

    out = subnet_forward(x, params)
    jax.block_until_ready(out)
    assert out.shape == (batch, hidden_size)
    assert bool(jnp.all(jnp.isfinite(out)))

    ref = subnet_reference(x, params)
    assert bool(jnp.allclose(out, ref, rtol=1e-1, atol=1e-1))

    print("KERNEL_OK")
</pallas_src>

<mosaic_0001>
module attributes {stable_mosaic.version = 11 : i64} {
  func.func @subnet_kernel(%arg0: i32, %arg1: memref<128x128xbf16, #tpu.memory_space<vmem>>, %arg2: memref<128x128xbf16, #tpu.memory_space<vmem>>, %arg3: memref<1x128xf32, #tpu.memory_space<vmem>>, %arg4: memref<128x128xbf16, #tpu.memory_space<vmem>>, %arg5: memref<1x128xf32, #tpu.memory_space<vmem>>, %arg6: memref<128x128xbf16, #tpu.memory_space<vmem>>, %arg7: memref<1x128xf32, #tpu.memory_space<vmem>>, %arg8: memref<128x128xf32, #tpu.memory_space<vmem>>, %arg9: memref<128x128xf32, #tpu.memory_space<vmem>>) attributes {dimension_semantics = [#tpu.dimension_semantics<parallel>], iteration_bounds = array<i64: 2>, scalar_prefetch = 0 : i64, scratch_operands = 1 : i64, tpu.core_type = #tpu.core_type<tc>, window_params = [{transform_indices = @transform_0, window_bounds = array<i64: 128, 128>}, {pipeline_mode = #tpu.pipeline_mode<synchronous>, transform_indices = @transform_1, window_bounds = array<i64: 128, 128>}, {pipeline_mode = #tpu.pipeline_mode<synchronous>, transform_indices = @transform_2, window_bounds = array<i64: 1, 128>}, {pipeline_mode = #tpu.pipeline_mode<synchronous>, transform_indices = @transform_3, window_bounds = array<i64: 128, 128>}, {pipeline_mode = #tpu.pipeline_mode<synchronous>, transform_indices = @transform_4, window_bounds = array<i64: 1, 128>}, {pipeline_mode = #tpu.pipeline_mode<synchronous>, transform_indices = @transform_5, window_bounds = array<i64: 128, 128>}, {pipeline_mode = #tpu.pipeline_mode<synchronous>, transform_indices = @transform_6, window_bounds = array<i64: 1, 128>}, {transform_indices = @transform_7, window_bounds = array<i64: 128, 128>}]} {
    %c0 = arith.constant 0 : index
    %c0_0 = arith.constant 0 : index
    %0 = vector.load %arg1[%c0, %c0_0] : memref<128x128xbf16, #tpu.memory_space<vmem>>, vector<128x128xbf16>
    %c0_1 = arith.constant 0 : index
    %c0_2 = arith.constant 0 : index
    %1 = vector.load %arg2[%c0_1, %c0_2] : memref<128x128xbf16, #tpu.memory_space<vmem>>, vector<128x128xbf16>
    %cst = arith.constant dense<0.000000e+00> : vector<128x128xf32>
    %2 = tpu.matmul %0, %1, %cst {dimension_numbers = #tpu.dot_dimension_numbers<[1], [0], [0], [1], [0, 0, 1, 1], [], []>} : vector<128x128xbf16>, vector<128x128xbf16>, vector<128x128xf32> -> vector<128x128xf32>
    %c0_3 = arith.constant 0 : index
    %c0_4 = arith.constant 0 : index
    %3 = vector.load %arg3[%c0_3, %c0_4] : memref<1x128xf32, #tpu.memory_space<vmem>>, vector<1x128xf32>
    %4 = vector.broadcast %3 : vector<1x128xf32> to vector<128x128xf32>
    %5 = arith.addf %2, %4 : vector<128x128xf32>
    %cst_5 = arith.constant 0.000000e+00 : f32
    %6 = vector.broadcast %cst_5 : f32 to vector<128x128xf32>
    %7 = arith.maximumf %5, %6 : vector<128x128xf32>
    %c0_6 = arith.constant 0 : index
    %c0_7 = arith.constant 0 : index
    %8 = vector.load %arg9[%c0_6, %c0_7] : memref<128x128xf32, #tpu.memory_space<vmem>>, vector<128x128xf32>
    tpu.vector_store %arg9[%c0_6, %c0_7], %7 {strides = array<i32>} : memref<128x128xf32, #tpu.memory_space<vmem>>, vector<128x128xf32>,
    %c0_8 = arith.constant 0 : index
    %c0_9 = arith.constant 0 : index
    %9 = vector.load %arg9[%c0_8, %c0_9] : memref<128x128xf32, #tpu.memory_space<vmem>>, vector<128x128xf32>
    %10 = arith.truncf %9 : vector<128x128xf32> to vector<128x128xbf16>
    %c0_10 = arith.constant 0 : index
    %c0_11 = arith.constant 0 : index
    %11 = vector.load %arg4[%c0_10, %c0_11] : memref<128x128xbf16, #tpu.memory_space<vmem>>, vector<128x128xbf16>
    %cst_12 = arith.constant dense<0.000000e+00> : vector<128x128xf32>
    %12 = tpu.matmul %10, %11, %cst_12 {dimension_numbers = #tpu.dot_dimension_numbers<[1], [0], [0], [1], [0, 0, 1, 1], [], []>} : vector<128x128xbf16>, vector<128x128xbf16>, vector<128x128xf32> -> vector<128x128xf32>
    %c0_13 = arith.constant 0 : index
    %c0_14 = arith.constant 0 : index
    %13 = vector.load %arg5[%c0_13, %c0_14] : memref<1x128xf32, #tpu.memory_space<vmem>>, vector<1x128xf32>
    %14 = vector.broadcast %13 : vector<1x128xf32> to vector<128x128xf32>
    %15 = arith.addf %12, %14 : vector<128x128xf32>
    %cst_15 = arith.constant 0.000000e+00 : f32
    %16 = vector.broadcast %cst_15 : f32 to vector<128x128xf32>
    %17 = arith.maximumf %15, %16 : vector<128x128xf32>
    %c0_16 = arith.constant 0 : index
    %c0_17 = arith.constant 0 : index
    %18 = vector.load %arg9[%c0_16, %c0_17] : memref<128x128xf32, #tpu.memory_space<vmem>>, vector<128x128xf32>
    tpu.vector_store %arg9[%c0_16, %c0_17], %17 {strides = array<i32>} : memref<128x128xf32, #tpu.memory_space<vmem>>, vector<128x128xf32>,
    %c0_18 = arith.constant 0 : index
    %c0_19 = arith.constant 0 : index
    %19 = vector.load %arg9[%c0_18, %c0_19] : memref<128x128xf32, #tpu.memory_space<vmem>>, vector<128x128xf32>
    %20 = arith.truncf %19 : vector<128x128xf32> to vector<128x128xbf16>
    %c0_20 = arith.constant 0 : index
    %c0_21 = arith.constant 0 : index
    %21 = vector.load %arg6[%c0_20, %c0_21] : memref<128x128xbf16, #tpu.memory_space<vmem>>, vector<128x128xbf16>
    %cst_22 = arith.constant dense<0.000000e+00> : vector<128x128xf32>
    %22 = tpu.matmul %20, %21, %cst_22 {dimension_numbers = #tpu.dot_dimension_numbers<[1], [0], [0], [1], [0, 0, 1, 1], [], []>} : vector<128x128xbf16>, vector<128x128xbf16>, vector<128x128xf32> -> vector<128x128xf32>
    %c0_23 = arith.constant 0 : index
    %c0_24 = arith.constant 0 : index
    %23 = vector.load %arg7[%c0_23, %c0_24] : memref<1x128xf32, #tpu.memory_space<vmem>>, vector<1x128xf32>
    %24 = vector.broadcast %23 : vector<1x128xf32> to vector<128x128xf32>
    %25 = arith.addf %22, %24 : vector<128x128xf32>
    %cst_25 = arith.constant 0.000000e+00 : f32
    %26 = vector.broadcast %cst_25 : f32 to vector<128x128xf32>
    %27 = arith.maximumf %25, %26 : vector<128x128xf32>
    %c0_26 = arith.constant 0 : index
    %c0_27 = arith.constant 0 : index
    %28 = vector.load %arg8[%c0_26, %c0_27] : memref<128x128xf32, #tpu.memory_space<vmem>>, vector<128x128xf32>
    tpu.vector_store %arg8[%c0_26, %c0_27], %27 {strides = array<i32>} : memref<128x128xf32, #tpu.memory_space<vmem>>, vector<128x128xf32>,
    return
  }
  func.func @transform_0(%arg0: i32) -> (i32, i32) {
    %c0_i32 = arith.constant 0 : i32
    %c0_i32_0 = arith.constant 0 : i32
    return %arg0, %c0_i32 : i32, i32
  }
  func.func @transform_1(%arg0: i32) -> (i32, i32) {
    %c0_i32 = arith.constant 0 : i32
    %c0_i32_0 = arith.constant 0 : i32
    %c0_i32_1 = arith.constant 0 : i32
    return %c0_i32, %c0_i32_0 : i32, i32
  }
  func.func @transform_2(%arg0: i32) -> (i32, i32) {
    %c0_i32 = arith.constant 0 : i32
    %c0_i32_0 = arith.constant 0 : i32
    %c0_i32_1 = arith.constant 0 : i32
    return %c0_i32, %c0_i32_0 : i32, i32
  }
  func.func @transform_3(%arg0: i32) -> (i32, i32) {
    %c0_i32 = arith.constant 0 : i32
    %c0_i32_0 = arith.constant 0 : i32
    %c0_i32_1 = arith.constant 0 : i32
    return %c0_i32, %c0_i32_0 : i32, i32
  }
  func.func @transform_4(%arg0: i32) -> (i32, i32) {
    %c0_i32 = arith.constant 0 : i32
    %c0_i32_0 = arith.constant 0 : i32
    %c0_i32_1 = arith.constant 0 : i32
    return %c0_i32, %c0_i32_0 : i32, i32
  }
  func.func @transform_5(%arg0: i32) -> (i32, i32) {
    %c0_i32 = arith.constant 0 : i32
    %c0_i32_0 = arith.constant 0 : i32
    %c0_i32_1 = arith.constant 0 : i32
    return %c0_i32, %c0_i32_0 : i32, i32
  }
  func.func @transform_6(%arg0: i32) -> (i32, i32) {
    %c0_i32 = arith.constant 0 : i32
    %c0_i32_0 = arith.constant 0 : i32
    %c0_i32_1 = arith.constant 0 : i32
    return %c0_i32, %c0_i32_0 : i32, i32
  }
  func.func @transform_7(%arg0: i32) -> (i32, i32) {
    %c0_i32 = arith.constant 0 : i32
    %c0_i32_0 = arith.constant 0 : i32
    return %arg0, %c0_i32 : i32, i32
  }
}

</mosaic_0001>

<bundles_post_ra>
// kernel: subnet_forward.1
= control target key start
LH: loop header
LB: loop body
LE: loop exit
PB: predicated region body
PF: predicated region fallthrough
CT: control target
= control target key end

     0   :  { %s1151_s24 = smov 0   ;;  %s1307_s0 = inlined_call_operand.vmem [shape: bf16[256,128], index: 0, kind: input, shape index: {}]   ;;  %s1308_s1 = inlined_call_operand.vmem [shape: bf16[128,128], index: 1, kind: input, shape index: {}]   ;;  %s1309_s2 = inlined_call_operand.vmem [shape: f32[1,128], index: 2, kind: input, shape index: {}]   ;;  %s1310_s3 = inlined_call_operand.vmem [shape: bf16[128,128], index: 3, kind: input, shape index: {}]   ;;  %s1311_s4 = inlined_call_operand.vmem [shape: f32[1,128], index: 4, kind: input, shape index: {}]   ;;  %s1312_s5 = inlined_call_operand.vmem [shape: bf16[128,128], index: 5, kind: input, shape index: {}]   ;;  %s1313_s6 = inlined_call_operand.vmem [shape: f32[1,128], index: 6, kind: input, shape index: {}]   ;;  %s1314_s7 = inlined_call_operand.vmem [shape: f32[256,128], index: 7, kind: output, shape index: {}]  }
   0x1 LB: > { %s897_s25 = sadd.s32 4294967295, %s1109_s24   ;;  %p901_p0 = scmp.ge.s32.totalorder %s1109_s24, 1  ;;  %s1109_s24 = sphi %s1151_s24, %s17_s24  }
   0x2   : > { %p238_p1 = scmp.lt.s32.totalorder %s1109_s24, 3 }
   0x4   : > { %p239_p2 = pnand %p901_p0, %p238_p1 }
   0x5   : > { %s902_s11 = sshll.u32 (!%p239_p2), %s897_s25, 4 }
   0x6   : > { %242 = sbr.rel (%p239_p2) target bundleno = 548 (0x224), region = 48  ;;  %p271_p3 = scmp.lt.s32.totalorder (!%p239_p2), %s902_s11, 31 }
   0xb   : > { %v1051_v0 = vld [vmem:[%s1308_s1 + $0x38] sm:$0xff]  ;;  %v1050_v1 = vld [vmem:[%s1308_s1 + $0x30] sm:$0xff]  ;;  %v1049_v2 = vld [vmem:[%s1308_s1 + $0x28] sm:$0xff]  ;;  %s1316_s11 = smov (!%p271_p3, %s902_s11), 31 }
   0xc   : > { %414 = vmatpush.bf16.msra.mxu0 %v1051_v0  ;;  %1068 = vmatpush.bf16.msra.mxu3 %v1051_v0  ;;  %v1048_v3 = vld [vmem:[%s1308_s1 + $0x20] sm:$0xff]  ;;  %v1047_v4 = vld [vmem:[%s1308_s1 + $0x18] sm:$0xff]  ;;  %v1046_v5 = vld [vmem:[%s1308_s1 + $0x10] sm:$0xff]  ;;  %s903_s18 = sshll.u32 %s1316_s11, 2  ;;  %s905_s20 = sshll.u32 %s1316_s11, 3 }
   0xd   : > { %v1045_v6 = vld [vmem:[%s1308_s1 + $0x8] sm:$0xff]  ;;  %v1044_v7 = vld [vmem:[%s1308_s1] sm:$0xff]  ;;  %s274_s23 = scalar_lea.vmem %s1307_s0, %s903_s18  ;;  %v1059_v14 = vld [vmem:[%s1310_s3 + $0x38] sm:$0xff] }
   0xe   : > { %v1036_v8 = vld [vmem:[%s274_s23] sm:$0xff]  ;;  %v1042_v9 = vld [vmem:[%s274_s23 + $0x30] sm:$0xff]  ;;  %v1037_v10 = vld [vmem:[%s274_s23 + $0x8] sm:$0xff]  ;;  %587 = vmatpush.bf16.msra.mxu1 %v1059_v14 }
   0xf   : > { %v1043_v11 = vld [vmem:[%s274_s23 + $0x38] sm:$0xff]  ;;  %v1038_v12 = vld [vmem:[%s274_s23 + $0x10] sm:$0xff]  ;;  %v1057_v16 = vld [vmem:[%s1310_s3 + $0x28] sm:$0xff] }
  0x10   : > { %415 = vmatpush.bf16.msra.mxu0 %v1050_v1  ;;  %1069 = vmatpush.bf16.msra.mxu3 %v1050_v1  ;;  %v1039_v13 = vld [vmem:[%s274_s23 + $0x18] sm:$0xff]  ;;  %v1058_v15 = vld [vmem:[%s1310_s3 + $0x30] sm:$0xff]  ;;  %v1056_v17 = vld [vmem:[%s1310_s3 + $0x20] sm:$0xff] }
  0x11   : > { %v1040_v18 = vld [vmem:[%s274_s23 + $0x20] sm:$0xff]  ;;  %v1041_v19 = vld [vmem:[%s274_s23 + $0x28] sm:$0xff]  ;;  %v1055_v20 = vld [vmem:[%s1310_s3 + $0x18] sm:$0xff]  ;;  %s1271_s23 = scalar_lea.vmem %s1314_s7, %s905_s20 }
  0x12   : > { %588 = vmatpush.bf16.msra.mxu1 %v1058_v15  ;;  %v1054_v21 = vld [vmem:[%s1310_s3 + $0x10] sm:$0xff]  ;;  %v1053_v22 = vld [vmem:[%s1310_s3 + $0x8] sm:$0xff]  ;;  %v1052_v23 = vld [vmem:[%s1310_s3] sm:$0xff] }
  0x13   : > { %v1216_v25 = vld [vmem:[%s1309_s2] ss:$0 sm:$0xff] }
  0x14   : > { %416 = vmatpush.bf16.msra.mxu0 %v1049_v2  ;;  %1070 = vmatpush.bf16.msra.mxu3 %v1049_v2 }
  0x16   : > { %589 = vmatpush.bf16.msra.mxu1 %v1057_v16 }
  0x18   : > { %417 = vmatpush.bf16.msra.mxu0 %v1048_v3  ;;  %1071 = vmatpush.bf16.msra.mxu3 %v1048_v3  ;;  %v1067_v3 = vld [vmem:[%s1312_s5 + $0x38] sm:$0xff] }
  0x19   : > { %760 = vmatpush.bf16.msra.mxu2 %v1067_v3 }
  0x1a   : > { %590 = vmatpush.bf16.msra.mxu1 %v1056_v17 }
  0x1c   : > { %418 = vmatpush.bf16.msra.mxu0 %v1047_v4  ;;  %1072 = vmatpush.bf16.msra.mxu3 %v1047_v4 }
  0x1e   : > { %591 = vmatpush.bf16.msra.mxu1 %v1055_v20 }
  0x20   : > { %419 = vmatpush.bf16.msra.mxu0 %v1046_v5  ;;  %1073 = vmatpush.bf16.msra.mxu3 %v1046_v5  ;;  %v1066_v5 = vld [vmem:[%s1312_s5 + $0x30] sm:$0xff] }
  0x21   : > { %761 = vmatpush.bf16.msra.mxu2 %v1066_v5 }
  0x22   : > { %592 = vmatpush.bf16.msra.mxu1 %v1054_v21 }
  0x24   : > { %420 = vmatpush.bf16.msra.mxu0 %v1045_v6  ;;  %1074 = vmatpush.bf16.msra.mxu3 %v1045_v6  ;;  %v1065_v6 = vld [vmem:[%s1312_s5 + $0x28] sm:$0xff] }
  0x25   : > { %762 = vmatpush.bf16.msra.mxu2 %v1065_v6 }
  0x26   : > { %593 = vmatpush.bf16.msra.mxu1 %v1053_v22 }
  0x28   : > { %421 = vmatpush.bf16.msra.mxu0 %v1044_v7  ;;  %1075 = vmatpush.bf16.msra.mxu3 %v1044_v7 }
  0x2a   : > { %594 = vmatpush.bf16.msra.mxu1 %v1052_v23 }
  0x2b   : > { %422 = vmatmul.bf16.vlgmr.msra.gmra.mxu0 %v1036_v8  ;;  %452 = vmatmul.bf16.vlgmr.msra.gmra.mxu3 %v1042_v9 }
  0x2c   : > { %1076 = vmatpush.bf16.msrb.mxu3 %v1059_v14 }
  0x30   : > { %1077 = vmatpush.bf16.msrb.mxu3 %v1058_v15 }
  0x34   : > { %1078 = vmatpush.bf16.msrb.mxu3 %v1057_v16 }
  0x38   : > { %1079 = vmatpush.bf16.msrb.mxu3 %v1056_v17 }
  0x3b   : > { %427 = vmatmul.bf16.gmra.mxu0 %v1037_v10  ;;  %457 = vmatmul.bf16.gmra.mxu3 %v1043_v11  ;;  %v1064_v10 = vld [vmem:[%s1312_s5 + $0x20] sm:$0xff] }
  0x3c   : > { %1080 = vmatpush.bf16.msrb.mxu3 %v1055_v20  ;;  %763 = vmatpush.bf16.msra.mxu2 %v1064_v10 }
  0x40   : > { %1081 = vmatpush.bf16.msrb.mxu3 %v1054_v21  ;;  %v1063_v21 = vld [vmem:[%s1312_s5 + $0x18] sm:$0xff] }
  0x41   : > { %764 = vmatpush.bf16.msra.mxu2 %v1063_v21 }
  0x44   : > { %1082 = vmatpush.bf16.msrb.mxu3 %v1053_v22  ;;  %v1062_v22 = vld [vmem:[%s1312_s5 + $0x10] sm:$0xff] }
  0x45   : > { %765 = vmatpush.bf16.msra.mxu2 %v1062_v22 }
  0x48   : > { %1083 = vmatpush.bf16.msrb.mxu3 %v1052_v23  ;;  %v1061_v23 = vld [vmem:[%s1312_s5 + $0x8] sm:$0xff] }
  0x49   : > { %766 = vmatpush.bf16.msra.mxu2 %v1061_v23 }
  0x4b   : > { %432 = vmatmul.bf16.gmra.mxu0 %v1038_v12 }
  0x4c   : > { %1084 = vmatpush.bf16.msra.mxu3 %v1067_v3 }
  0x50   : > { %1085 = vmatpush.bf16.msra.mxu3 %v1066_v5 }
  0x54   : > { %1086 = vmatpush.bf16.msra.mxu3 %v1065_v6 }
  0x58   : > { %1087 = vmatpush.bf16.msra.mxu3 %v1064_v10 }
  0x5b   : > { %437 = vmatmul.bf16.gmra.mxu0 %v1039_v13 }
  0x5c   : > { %1088 = vmatpush.bf16.msra.mxu3 %v1063_v21 }
  0x60   : > { %1089 = vmatpush.bf16.msra.mxu3 %v1062_v22 }
  0x64   : > { %1090 = vmatpush.bf16.msra.mxu3 %v1061_v23 }
  0x6b   : > { %442 = vmatmul.bf16.gmra.mxu0 %v1040_v18 }
  0x7b   : > { %447 = vmatmul.bf16.gmra.mxu0 %v1041_v19 }
  0xa8   : > { %v423_v24 = vpop.f32.mrf.mxu0 }
  0xa9   : > { %v424_v27 = vadd.f32 %v1216_v25, %v423_v24  ;;  %v1060_v24 = vld [vmem:[%s1312_s5] sm:$0xff] }
  0xaa   : > { %767 = vmatpush.bf16.msra.mxu2 %v1060_v24  ;;  %1091 = vmatpush.bf16.msra.mxu3 %v1060_v24 }
  0xab   : > { %v463_v30 = vmax.f32 %v424_v27, 0.0 }
  0xae   : > { %v453_v26 = vpop.f32.mrf.mxu3 }
  0xaf   : > { %v454_v32 = vadd.f32 %v1216_v25, %v453_v26  ;;  %v1101_v26 = vld [vmem:[%s1311_s4] ss:$0 sm:$0xff] }
  0xb0   : > { %v425_v28 = vpop.f32.mrf.mxu0 }
  0xb1   : > { %v426_v29 = vadd.f32 %v1216_v25, %v425_v28  ;;  %v475_v35 = vmax.f32 %v454_v32, 0.0 }
  0xb3   : > { %v464_v31 = vmax.f32 %v426_v29, 0.0 }
  0xb5   : > { %v511_v33 = vpack.c.bf16 %v464_v31, %v463_v30 }
  0xb6   : > { %v455_v34 = vpop.f32.mrf.mxu3 }
  0xb7   : > { %595 = vmatmul.bf16.vlgmr.msra.gmra.mxu1 %v511_v33  ;;  %v456_v36 = vadd.f32 %v1216_v25, %v455_v34 }
  0xb8   : > { %v428_v37 = vpop.f32.mrf.mxu0 }
  0xb9   : > { %v476_v38 = vmax.f32 %v456_v36, 0.0  ;;  %v429_v41 = vadd.f32 %v1216_v25, %v428_v37 }
  0xbb   : > { %v517_v39 = vpack.c.bf16 %v476_v38, %v475_v35  ;;  %v465_v44 = vmax.f32 %v429_v41, 0.0 }
  0xbd   : > { %625 = vmatmul.bf16.vlgmr.msrb.gmra.mxu3 %v517_v39 }
  0xbe   : > { %v458_v40 = vpop.f32.mrf.mxu3 }
  0xbf   : > { %v459_v46 = vadd.f32 %v1216_v25, %v458_v40 }
  0xc0   : > { %v430_v42 = vpop.f32.mrf.mxu0 }
  0xc1   : > { %v431_v43 = vadd.f32 %v1216_v25, %v430_v42  ;;  %v477_v49 = vmax.f32 %v459_v46, 0.0 }
  0xc3   : > { %v466_v45 = vmax.f32 %v431_v43, 0.0 }
  0xc5   : > { %v512_v47 = vpack.c.bf16 %v466_v45, %v465_v44 }
  0xc6   : > { %v460_v48 = vpop.f32.mrf.mxu3 }
  0xc7   : > { %600 = vmatmul.bf16.gmra.mxu1 %v512_v47  ;;  %v461_v50 = vadd.f32 %v1216_v25, %v460_v48 }
  0xc8   : > { %v433_v51 = vpop.f32.mrf.mxu0 }
  0xc9   : > { %v478_v52 = vmax.f32 %v461_v50, 0.0  ;;  %v434_v54 = vadd.f32 %v1216_v25, %v433_v51 }
  0xcb   : > { %v518_v53 = vpack.c.bf16 %v478_v52, %v477_v49  ;;  %v467_v57 = vmax.f32 %v434_v54, 0.0 }
  0xcd   : > { %630 = vmatmul.bf16.gmra.mxu3 %v518_v53 }
  0xd0   : > { %v435_v55 = vpop.f32.mrf.mxu0 }
  0xd1   : > { %v436_v56 = vadd.f32 %v1216_v25, %v435_v55 }
  0xd3   : > { %v468_v58 = vmax.f32 %v436_v56, 0.0 }
  0xd5   : > { %v513_v59 = vpack.c.bf16 %v468_v58, %v467_v57 }
  0xd7   : > { %605 = vmatmul.bf16.gmra.mxu1 %v513_v59 }
  0xd8   : > { %v438_v60 = vpop.f32.mrf.mxu0 }
  0xd9   : > { %v439_v61 = vadd.f32 %v1216_v25, %v438_v60 }
  0xdb   : > { %v469_v0 = vmax.f32 %v439_v61, 0.0 }
  0xe0   : > { %v440_v62 = vpop.f32.mrf.mxu0 }
  0xe1   : > { %v441_v63 = vadd.f32 %v1216_v25, %v440_v62 }
  0xe3   : > { %v470_v1 = vmax.f32 %v441_v63, 0.0 }
  0xe5   : > { %v514_v2 = vpack.c.bf16 %v470_v1, %v469_v0 }
  0xe7   : > { %610 = vmatmul.bf16.gmra.mxu1 %v514_v2 }
  0xe8   : > { %v443_v4 = vpop.f32.mrf.mxu0 }
  0xe9   : > { %v444_v7 = vadd.f32 %v1216_v25, %v443_v4 }
  0xeb   : > { %v471_v11 = vmax.f32 %v444_v7, 0.0 }
  0xf0   : > { %v445_v8 = vpop.f32.mrf.mxu0 }
  0xf1   : > { %v446_v9 = vadd.f32 %v1216_v25, %v445_v8 }
  0xf3   : > { %v472_v12 = vmax.f32 %v446_v9, 0.0 }
  0xf5   : > { %v515_v13 = vpack.c.bf16 %v472_v12, %v471_v11 }
  0xf7   : > { %615 = vmatmul.bf16.gmra.mxu1 %v515_v13 }
  0xf8   : > { %v448_v14 = vpop.f32.mrf.mxu0 }
  0xf9   : > { %v449_v15 = vadd.f32 %v1216_v25, %v448_v14 }
  0xfb   : > { %v473_v18 = vmax.f32 %v449_v15, 0.0 }
 0x100   : > { %v450_v16 = vpop.f32.mrf.mxu0 }
 0x101   : > { %v451_v17 = vadd.f32 %v1216_v25, %v450_v16 }
 0x103   : > { %v474_v19 = vmax.f32 %v451_v17, 0.0 }
 0x105   : > { %v516_v20 = vpack.c.bf16 %v474_v19, %v473_v18  ;;  %v1264_v18 = vld [vmem:[%s1313_s6] ss:$0 sm:$0xff] }
 0x107   : > { %620 = vmatmul.bf16.gmra.mxu1 %v516_v20 }
 0x134   : > { %v596_v25 = vpop.f32.mrf.mxu1 }
 0x135   : > { %v597_v27 = vadd.f32 %v1101_v26, %v596_v25 }
 0x137   : > { %v636_v30 = vmax.f32 %v597_v27, 0.0 }
 0x13c   : > { %v598_v28 = vpop.f32.mrf.mxu1 }
 0x13d   : > { %v599_v29 = vadd.f32 %v1101_v26, %v598_v28 }
 0x13f   : > { %v637_v31 = vmax.f32 %v599_v29, 0.0 }
 0x140   : > { %v626_v32 = vpop.f32.mrf.mxu3 }
 0x141   : > { %v684_v33 = vpack.c.bf16 %v637_v31, %v636_v30  ;;  %v627_v35 = vadd.f32 %v1101_v26, %v626_v32 }
 0x143   : > { %768 = vmatmul.bf16.vlgmr.msra.gmra.mxu2 %v684_v33  ;;  %v648_v37 = vmax.f32 %v627_v35, 0.0 }
 0x144   : > { %v601_v34 = vpop.f32.mrf.mxu1 }
 0x145   : > { %v602_v39 = vadd.f32 %v1101_v26, %v601_v34 }
 0x147   : > { %v638_v44 = vmax.f32 %v602_v39, 0.0 }
 0x148   : > { %v628_v36 = vpop.f32.mrf.mxu3 }
 0x149   : > { %v629_v38 = vadd.f32 %v1101_v26, %v628_v36 }
 0x14b   : > { %v649_v40 = vmax.f32 %v629_v38, 0.0 }
 0x14c   : > { %v603_v41 = vpop.f32.mrf.mxu1 }
 0x14d   : > { %v604_v42 = vadd.f32 %v1101_v26, %v603_v41  ;;  %v690_v43 = vpack.c.bf16 %v649_v40, %v648_v37 }
 0x14f   : > { %v639_v45 = vmax.f32 %v604_v42, 0.0  ;;  %798 = vmatmul.bf16.vlgmr.msra.gmra.mxu3 %v690_v43 }
 0x150   : > { %v631_v46 = vpop.f32.mrf.mxu3 }
 0x151   : > { %v685_v47 = vpack.c.bf16 %v639_v45, %v638_v44  ;;  %v632_v49 = vadd.f32 %v1101_v26, %v631_v46 }
 0x153   : > { %773 = vmatmul.bf16.gmra.mxu2 %v685_v47  ;;  %v650_v51 = vmax.f32 %v632_v49, 0.0 }
 0x154   : > { %v606_v48 = vpop.f32.mrf.mxu1 }
 0x155   : > { %v607_v53 = vadd.f32 %v1101_v26, %v606_v48 }
 0x157   : > { %v640_v58 = vmax.f32 %v607_v53, 0.0 }
 0x158   : > { %v633_v50 = vpop.f32.mrf.mxu3 }
 0x159   : > { %v634_v52 = vadd.f32 %v1101_v26, %v633_v50 }
 0x15b   : > { %v651_v54 = vmax.f32 %v634_v52, 0.0 }
 0x15c   : > { %v608_v55 = vpop.f32.mrf.mxu1 }
 0x15d   : > { %v609_v56 = vadd.f32 %v1101_v26, %v608_v55  ;;  %v691_v57 = vpack.c.bf16 %v651_v54, %v650_v51 }
 0x15f   : > { %v641_v59 = vmax.f32 %v609_v56, 0.0  ;;  %803 = vmatmul.bf16.gmra.mxu3 %v691_v57 }
 0x161   : > { %v686_v60 = vpack.c.bf16 %v641_v59, %v640_v58 }
 0x163   : > { %778 = vmatmul.bf16.gmra.mxu2 %v686_v60 }
 0x164   : > { %v611_v61 = vpop.f32.mrf.mxu1 }
 0x165   : > { %v612_v62 = vadd.f32 %v1101_v26, %v611_v61 }
 0x167   : > { %v642_v1 = vmax.f32 %v612_v62, 0.0 }
 0x16c   : > { %v613_v63 = vpop.f32.mrf.mxu1 }
 0x16d   : > { %v614_v0 = vadd.f32 %v1101_v26, %v613_v63 }
 0x16f   : > { %v643_v2 = vmax.f32 %v614_v0, 0.0 }
 0x171   : > { %v687_v3 = vpack.c.bf16 %v643_v2, %v642_v1 }
 0x173   : > { %783 = vmatmul.bf16.gmra.mxu2 %v687_v3 }
 0x174   : > { %v616_v4 = vpop.f32.mrf.mxu1 }
 0x175   : > { %v617_v5 = vadd.f32 %v1101_v26, %v616_v4 }
 0x177   : > { %v644_v8 = vmax.f32 %v617_v5, 0.0 }
 0x17c   : > { %v618_v6 = vpop.f32.mrf.mxu1 }
 0x17d   : > { %v619_v7 = vadd.f32 %v1101_v26, %v618_v6 }
 0x17f   : > { %v645_v9 = vmax.f32 %v619_v7, 0.0 }
 0x181   : > { %v688_v10 = vpack.c.bf16 %v645_v9, %v644_v8 }
 0x183   : > { %788 = vmatmul.bf16.gmra.mxu2 %v688_v10 }
 0x184   : > { %v621_v11 = vpop.f32.mrf.mxu1 }
 0x185   : > { %v622_v12 = vadd.f32 %v1101_v26, %v621_v11 }
 0x187   : > { %v646_v15 = vmax.f32 %v622_v12, 0.0 }
 0x18c   : > { %v623_v13 = vpop.f32.mrf.mxu1 }
 0x18d   : > { %v624_v14 = vadd.f32 %v1101_v26, %v623_v13 }
 0x18f   : > { %v647_v16 = vmax.f32 %v624_v14, 0.0 }
 0x191   : > { %v689_v17 = vpack.c.bf16 %v647_v16, %v646_v15 }
 0x193   : > { %793 = vmatmul.bf16.gmra.mxu2 %v689_v17 }
 0x1c6   : > { %v769_v19 = vpop.f32.mrf.mxu2 }
 0x1c7   : > { %v770_v20 = vadd.f32 %v1264_v18, %v769_v19 }
 0x1c9   : > { %v809_v21 = vmax.f32 %v770_v20, 0.0 }
 0x1cb   : > { %825 = vst [vmem:[%s1271_s23] sm:$0xff] %v809_v21 }
 0x1ce   : > { %v771_v22 = vpop.f32.mrf.mxu2 }
 0x1cf   : > { %v772_v23 = vadd.f32 %v1264_v18, %v771_v22 }
 0x1d1   : > { %v810_v24 = vmax.f32 %v772_v23, 0.0 }
 0x1d2   : > { %v799_v25 = vpop.f32.mrf.mxu3 }
 0x1d3   : > { %826 = vst [vmem:[%s1271_s23 + $0x8] sm:$0xff] %v810_v24  ;;  %v800_v26 = vadd.f32 %v1264_v18, %v799_v25 }
 0x1d5   : > { %v821_v27 = vmax.f32 %v800_v26, 0.0 }
 0x1d6   : > { %v774_v28 = vpop.f32.mrf.mxu2 }
 0x1d7   : > { %v775_v29 = vadd.f32 %v1264_v18, %v774_v28  ;;  %837 = vst [vmem:[%s1271_s23 + $0x60] sm:$0xff] %v821_v27 }
 0x1d9   : > { %v811_v30 = vmax.f32 %v775_v29, 0.0 }
 0x1da   : > { %v801_v31 = vpop.f32.mrf.mxu3 }
 0x1db   : > { %827 = vst [vmem:[%s1271_s23 + $0x10] sm:$0xff] %v811_v30  ;;  %v802_v32 = vadd.f32 %v1264_v18, %v801_v31 }
 0x1dd   : > { %v822_v33 = vmax.f32 %v802_v32, 0.0 }
 0x1de   : > { %v776_v34 = vpop.f32.mrf.mxu2 }
 0x1df   : > { %v777_v35 = vadd.f32 %v1264_v18, %v776_v34  ;;  %838 = vst [vmem:[%s1271_s23 + $0x68] sm:$0xff] %v822_v33 }
 0x1e1   : > { %v812_v36 = vmax.f32 %v777_v35, 0.0 }
 0x1e2   : > { %v804_v37 = vpop.f32.mrf.mxu3 }
 0x1e3   : > { %828 = vst [vmem:[%s1271_s23 + $0x18] sm:$0xff] %v812_v36  ;;  %v805_v38 = vadd.f32 %v1264_v18, %v804_v37 }
 0x1e5   : > { %v823_v39 = vmax.f32 %v805_v38, 0.0 }
 0x1e6   : > { %v779_v40 = vpop.f32.mrf.mxu2 }
 0x1e7   : > { %v780_v41 = vadd.f32 %v1264_v18, %v779_v40  ;;  %839 = vst [vmem:[%s1271_s23 + $0x70] sm:$0xff] %v823_v39 }
 0x1e9   : > { %v813_v42 = vmax.f32 %v780_v41, 0.0 }
 0x1ea   : > { %v806_v43 = vpop.f32.mrf.mxu3 }
 0x1eb   : > { %829 = vst [vmem:[%s1271_s23 + $0x20] sm:$0xff] %v813_v42  ;;  %v807_v44 = vadd.f32 %v1264_v18, %v806_v43 }
 0x1ed   : > { %v824_v45 = vmax.f32 %v807_v44, 0.0 }
 0x1ee   : > { %v781_v46 = vpop.f32.mrf.mxu2 }
 0x1ef   : > { %v782_v47 = vadd.f32 %v1264_v18, %v781_v46  ;;  %840 = vst [vmem:[%s1271_s23 + $0x78] sm:$0xff] %v824_v45 }
 0x1f1   : > { %v814_v48 = vmax.f32 %v782_v47, 0.0 }
 0x1f3   : > { %830 = vst [vmem:[%s1271_s23 + $0x28] sm:$0xff] %v814_v48 }
 0x1f6   : > { %v784_v49 = vpop.f32.mrf.mxu2 }
 0x1f7   : > { %v785_v50 = vadd.f32 %v1264_v18, %v784_v49 }
 0x1f9   : > { %v815_v51 = vmax.f32 %v785_v50, 0.0 }
 0x1fb   : > { %831 = vst [vmem:[%s1271_s23 + $0x30] sm:$0xff] %v815_v51 }
 0x1fe   : > { %v786_v52 = vpop.f32.mrf.mxu2 }
 0x1ff   : > { %v787_v53 = vadd.f32 %v1264_v18, %v786_v52 }
 0x201   : > { %v816_v54 = vmax.f32 %v787_v53, 0.0 }
 0x203   : > { %832 = vst [vmem:[%s1271_s23 + $0x38] sm:$0xff] %v816_v54 }
 0x206   : > { %v789_v55 = vpop.f32.mrf.mxu2 }
 0x207   : > { %v790_v56 = vadd.f32 %v1264_v18, %v789_v55 }
 0x209   : > { %v817_v57 = vmax.f32 %v790_v56, 0.0 }
 0x20b   : > { %833 = vst [vmem:[%s1271_s23 + $0x40] sm:$0xff] %v817_v57 }
 0x20e   : > { %v791_v58 = vpop.f32.mrf.mxu2 }
 0x20f   : > { %v792_v59 = vadd.f32 %v1264_v18, %v791_v58 }
 0x211   : > { %v818_v60 = vmax.f32 %v792_v59, 0.0 }
 0x213   : > { %834 = vst [vmem:[%s1271_s23 + $0x48] sm:$0xff] %v818_v60 }
 0x216   : > { %v794_v61 = vpop.f32.mrf.mxu2 }
 0x217   : > { %v795_v62 = vadd.f32 %v1264_v18, %v794_v61 }
 0x219   : > { %v819_v63 = vmax.f32 %v795_v62, 0.0 }
 0x21b   : > { %835 = vst [vmem:[%s1271_s23 + $0x50] sm:$0xff] %v819_v63 }
 0x21e   : > { %v796_v0 = vpop.f32.mrf.mxu2 }
 0x21f   : > { %v797_v1 = vadd.f32 %v1264_v18, %v796_v0 }
 0x221   : > { %v820_v2 = vmax.f32 %v797_v1, 0.0 }
 0x223   : > { %836 = vst [vmem:[%s1271_s23 + $0x58] sm:$0xff] %v820_v2 }
 0x224 PF: > { %s17_s24 = sadd.s32 1, %s1109_s24  }
 0x225   : > { %p14_p4 = scmp.ge.s32.totalorder %s17_s24, 4  }
 0x227   :  { %16 = sbr.rel (!%p14_p4) target bundleno = 1 (0x1), region = 78 }

</bundles_post_ra>
